<compile_context>
chip_gen: v7x
topology: tpu7x:2x2x1
jax: 0.10.0
libtpu: 0.0.40
codegen_flags: <defaults>
</compile_context>

<pallas_src>
import jax
import jax.numpy as jnp
from jax.experimental import pallas as pl
from jax.experimental.pallas import tpu as pltpu


def gru_kernel(x_ref, wih_ref, whh_ref, bg_ref, bhn_ref, out_ref):
    """Single-invocation kernel: full-sequence GRU, everything VMEM-resident.

    x_ref   : (T*B, I)  time-major flattened input (row t*B + b)
    wih_ref : (I, 3H)   concatenated input->hidden gate weights (r, z, n)
    whh_ref : (H, 3H)   concatenated hidden->hidden gate weights (r, z, n)
    bg_ref  : (1, 3H)   [b_ir+b_hr, b_iz+b_hz, b_in]  (pre-folded on host)
    bhn_ref : (1, H)    b_hn (kept separate: gated by r)
    out_ref : (T, B, H) all hidden states, time-major
    """
    T, B, H = out_ref.shape

    # --- Hoisted input projection: one MXU matmul for all time steps. ------
    # No input reshape (x comes in already flattened); the single (T*B,3H) ->
    # (T,B,3H) view happens once and is off the recurrent chain.
    gi_all = (jnp.dot(x_ref[...], wih_ref[...],
                      preferred_element_type=jnp.float32)
              + bg_ref[...]).reshape(T, B, 3 * H)            # (T, B, 3H)

    whh = whh_ref[...]                                       # (H, 3H), resident
    bhn_b = jnp.broadcast_to(bhn_ref[...], (B, H))           # hoisted broadcast

    # --- Sequential recurrence, fully unrolled (T is small and static). ----
    h = jnp.zeros((B, H), jnp.float32)
    for t in range(T):
        gi = gi_all[t]                                       # leading-dim tile select
        gh = jnp.dot(h, whh, preferred_element_type=jnp.float32)  # (B, 3H), one MXU op/step
        rz = jax.nn.sigmoid(gi[:, :2 * H] + gh[:, :2 * H])
        r = rz[:, :H]
        z = rz[:, H:]
        n = jnp.tanh(gi[:, 2 * H:] + r * (gh[:, 2 * H:] + bhn_b))
        h = (1.0 - z) * n + z * h
        out_ref[t] = h                                       # plain leading-dim store


def encoder_ptr_gru(x, w_ih, w_hh, b_ih, b_hh):
    """Forward of nn.GRU(input_feature_size, hidden_size, batch_first=True), h_0 = 0.

    Parameters use the PyTorch layout:
      w_ih: (3H, I), w_hh: (3H, H), b_ih: (3H,), b_hh: (3H,) in gate order (r, z, n).
    Returns (out (B, T, H), hidden (1, B, H)).
    """
    B, T, I = x.shape
    H = w_hh.shape[1]

    # One-time host-side preprocessing (tiny, outside the recurrence).
    x_tb = jnp.transpose(x, (1, 0, 2)).reshape(T * B, I)      # time-major, flattened
    wih_cat = w_ih.T                                          # (I, 3H)
    whh_cat = w_hh.T                                          # (H, 3H)
    # Pre-fold biases: r/z gates take b_ih + b_hh; the n gate keeps b_in in the
    # hoisted projection and b_hn separately (it is multiplied by r).
    bg = jnp.concatenate([b_ih[:2 * H] + b_hh[:2 * H], b_ih[2 * H:]])[None, :]  # (1, 3H)
    bhn = b_hh[2 * H:][None, :]                                                 # (1, H)

    out_tbh = pl.pallas_call(
        gru_kernel,
        out_shape=jax.ShapeDtypeStruct((T, B, H), jnp.float32),
        grid_spec=pltpu.PrefetchScalarGridSpec(
            num_scalar_prefetch=0,
            grid=(1,),   # single grid step; the time loop lives inside the kernel
            in_specs=[
                pl.BlockSpec((T * B, I), lambda i: (0, 0)),    # x, time-major flattened
                pl.BlockSpec((I, 3 * H), lambda i: (0, 0)),    # W_ih concatenated
                pl.BlockSpec((H, 3 * H), lambda i: (0, 0)),    # W_hh concatenated
                pl.BlockSpec((1, 3 * H), lambda i: (0, 0)),    # folded gate biases
                pl.BlockSpec((1, H), lambda i: (0, 0)),        # b_hn
            ],
            out_specs=pl.BlockSpec((T, B, H), lambda i: (0, 0, 0)),
        ),
        compiler_params=pltpu.CompilerParams(
            dimension_semantics=("arbitrary",),
        ),
    )(x_tb, wih_cat, whh_cat, bg, bhn)

    out = jnp.transpose(out_tbh, (1, 0, 2))   # (B, T, H), batch_first like the module
    hidden = out_tbh[-1][None]                # (1, B, H): final hidden state
    return out, hidden


def gru_reference(x, w_ih, w_hh, b_ih, b_hh):
    """Pure-JAX reference matching PyTorch nn.GRU forward (h_0 = 0)."""
    B, T, I = x.shape
    H = w_hh.shape[1]
    w_ir, w_iz, w_in = jnp.split(w_ih, 3, axis=0)
    w_hr, w_hz, w_hn = jnp.split(w_hh, 3, axis=0)
    b_ir, b_iz, b_in = jnp.split(b_ih, 3)
    b_hr, b_hz, b_hn = jnp.split(b_hh, 3)

    def step(h, x_t):
        r = jax.nn.sigmoid(x_t @ w_ir.T + b_ir + h @ w_hr.T + b_hr)
        z = jax.nn.sigmoid(x_t @ w_iz.T + b_iz + h @ w_hz.T + b_hz)
        n = jnp.tanh(x_t @ w_in.T + b_in + r * (h @ w_hn.T + b_hn))
        h_new = (1.0 - z) * n + z * h
        return h_new, h_new

    h0 = jnp.zeros((B, H), jnp.float32)
    hN, out_tm = jax.lax.scan(step, h0, jnp.transpose(x, (1, 0, 2)))
    return jnp.transpose(out_tm, (1, 0, 2)), hN[None]


if __name__ == "__main__":
    # Small shapes consistent with the module: batch=2, seq=8,
    # input_feature_size=4, hidden_size=32.
    B, T, I, H = 2, 8, 4, 32

    key = jax.random.PRNGKey(0)
    kx, kwih, kwhh, kbih, kbhh = jax.random.split(key, 5)

    # PyTorch nn.GRU init: uniform(-1/sqrt(H), 1/sqrt(H)); PyTorch parameter layout.
    bound = 1.0 / float(H) ** 0.5
    x = jax.random.normal(kx, (B, T, I), jnp.float32)
    w_ih = jax.random.uniform(kwih, (3 * H, I), jnp.float32, -bound, bound)
    w_hh = jax.random.uniform(kwhh, (3 * H, H), jnp.float32, -bound, bound)
    b_ih = jax.random.uniform(kbih, (3 * H,), jnp.float32, -bound, bound)
    b_hh = jax.random.uniform(kbhh, (3 * H,), jnp.float32, -bound, bound)

    out, hidden = jax.jit(encoder_ptr_gru)(x, w_ih, w_hh, b_ih, b_hh)
    jax.block_until_ready((out, hidden))

    out_ref, hidden_ref = gru_reference(x, w_ih, w_hh, b_ih, b_hh)
    assert out.shape == (B, T, H) and hidden.shape == (1, B, H)
    assert jnp.allclose(out, out_ref, atol=1e-5, rtol=1e-5)
    assert jnp.allclose(hidden, hidden_ref, atol=1e-5, rtol=1e-5)

    print("KERNEL_OK")
</pallas_src>

<mosaic_0001>
module attributes {stable_mosaic.version = 11 : i64} {
  func.func @gru_kernel(%arg0: i32, %arg1: memref<16x4xf32, #tpu.memory_space<vmem>>, %arg2: memref<4x96xf32, #tpu.memory_space<vmem>>, %arg3: memref<32x96xf32, #tpu.memory_space<vmem>>, %arg4: memref<1x96xf32, #tpu.memory_space<vmem>>, %arg5: memref<1x32xf32, #tpu.memory_space<vmem>>, %arg6: memref<8x2x32xf32, #tpu.memory_space<vmem>>) attributes {dimension_semantics = [#tpu.dimension_semantics<arbitrary>], iteration_bounds = array<i64: 1>, scalar_prefetch = 0 : i64, scratch_operands = 0 : i64, tpu.core_type = #tpu.core_type<tc>, window_params = [{pipeline_mode = #tpu.pipeline_mode<synchronous>, transform_indices = @transform_0, window_bounds = array<i64: 16, 4>}, {pipeline_mode = #tpu.pipeline_mode<synchronous>, transform_indices = @transform_1, window_bounds = array<i64: 4, 96>}, {pipeline_mode = #tpu.pipeline_mode<synchronous>, transform_indices = @transform_2, window_bounds = array<i64: 32, 96>}, {pipeline_mode = #tpu.pipeline_mode<synchronous>, transform_indices = @transform_3, window_bounds = array<i64: 1, 96>}, {pipeline_mode = #tpu.pipeline_mode<synchronous>, transform_indices = @transform_4, window_bounds = array<i64: 1, 32>}, {pipeline_mode = #tpu.pipeline_mode<synchronous>, transform_indices = @transform_5, window_bounds = array<i64: 8, 2, 32>}]} {
    %c0 = arith.constant 0 : index
    %c0_0 = arith.constant 0 : index
    %0 = vector.load %arg1[%c0, %c0_0] : memref<16x4xf32, #tpu.memory_space<vmem>>, vector<16x4xf32>
    %c0_1 = arith.constant 0 : index
    %c0_2 = arith.constant 0 : index
    %1 = vector.load %arg2[%c0_1, %c0_2] : memref<4x96xf32, #tpu.memory_space<vmem>>, vector<4x96xf32>
    %cst = arith.constant dense<0.000000e+00> : vector<16x96xf32>
    %2 = tpu.matmul %0, %1, %cst {dimension_numbers = #tpu.dot_dimension_numbers<[1], [0], [0], [1], [0, 0, 1, 1], [], []>} : vector<16x4xf32>, vector<4x96xf32>, vector<16x96xf32> -> vector<16x96xf32>
    %c0_3 = arith.constant 0 : index
    %c0_4 = arith.constant 0 : index
    %3 = vector.load %arg4[%c0_3, %c0_4] : memref<1x96xf32, #tpu.memory_space<vmem>>, vector<1x96xf32>
    %4 = vector.broadcast %3 : vector<1x96xf32> to vector<16x96xf32>
    %5 = arith.addf %2, %4 : vector<16x96xf32>
    %6 = vector.shape_cast %5 : vector<16x96xf32> to vector<8x2x96xf32>
    %c0_5 = arith.constant 0 : index
    %c0_6 = arith.constant 0 : index
    %7 = vector.load %arg3[%c0_5, %c0_6] : memref<32x96xf32, #tpu.memory_space<vmem>>, vector<32x96xf32>
    %c0_7 = arith.constant 0 : index
    %c0_8 = arith.constant 0 : index
    %8 = vector.load %arg5[%c0_7, %c0_8] : memref<1x32xf32, #tpu.memory_space<vmem>>, vector<1x32xf32>
    %9 = vector.shape_cast %8 : vector<1x32xf32> to vector<1x32xf32>
    %10 = vector.broadcast %9 : vector<1x32xf32> to vector<2x32xf32>
    %cst_9 = arith.constant 0.000000e+00 : f32
    %11 = vector.broadcast %cst_9 : f32 to vector<2x32xf32>
    %12 = vector.extract_strided_slice %6 {offsets = [0, 0, 0], sizes = [1, 2, 96], strides = [1, 1, 1]} : vector<8x2x96xf32> to vector<1x2x96xf32>
    %13 = vector.shape_cast %12 : vector<1x2x96xf32> to vector<2x96xf32>
    %cst_10 = arith.constant dense<0.000000e+00> : vector<2x96xf32>
    %14 = tpu.matmul %11, %7, %cst_10 {dimension_numbers = #tpu.dot_dimension_numbers<[1], [0], [0], [1], [0, 0, 1, 1], [], []>} : vector<2x32xf32>, vector<32x96xf32>, vector<2x96xf32> -> vector<2x96xf32>
    %15 = vector.extract_strided_slice %13 {offsets = [0, 0], sizes = [2, 64], strides = [1, 1]} : vector<2x96xf32> to vector<2x64xf32>
    %16 = vector.extract_strided_slice %14 {offsets = [0, 0], sizes = [2, 64], strides = [1, 1]} : vector<2x96xf32> to vector<2x64xf32>
    %17 = arith.addf %15, %16 : vector<2x64xf32>
    %18 = arith.negf %17 : vector<2x64xf32>
    %19 = math.exp %18 : vector<2x64xf32>
    %cst_11 = arith.constant 1.000000e+00 : f32
    %20 = vector.broadcast %cst_11 : f32 to vector<2x64xf32>
    %21 = arith.addf %20, %19 : vector<2x64xf32>
    %22 = arith.divf %20, %21 : vector<2x64xf32>
    %23 = vector.extract_strided_slice %22 {offsets = [0, 0], sizes = [2, 32], strides = [1, 1]} : vector<2x64xf32> to vector<2x32xf32>
    %24 = vector.extract_strided_slice %22 {offsets = [0, 32], sizes = [2, 32], strides = [1, 1]} : vector<2x64xf32> to vector<2x32xf32>
    %25 = vector.extract_strided_slice %13 {offsets = [0, 64], sizes = [2, 32], strides = [1, 1]} : vector<2x96xf32> to vector<2x32xf32>
    %26 = vector.extract_strided_slice %14 {offsets = [0, 64], sizes = [2, 32], strides = [1, 1]} : vector<2x96xf32> to vector<2x32xf32>
    %27 = arith.addf %26, %10 : vector<2x32xf32>
    %28 = arith.mulf %23, %27 : vector<2x32xf32>
    %29 = arith.addf %25, %28 : vector<2x32xf32>
    %30 = math.tanh %29 : vector<2x32xf32>
    %cst_12 = arith.constant 1.000000e+00 : f32
    %31 = vector.broadcast %cst_12 : f32 to vector<2x32xf32>
    %32 = arith.subf %31, %24 : vector<2x32xf32>
    %33 = arith.mulf %32, %30 : vector<2x32xf32>
    %34 = arith.mulf %24, %11 : vector<2x32xf32>
    %35 = arith.addf %33, %34 : vector<2x32xf32>
    %c0_13 = arith.constant 0 : index
    %c0_14 = arith.constant 0 : index
    %c0_15 = arith.constant 0 : index
    %36 = vector.load %arg6[%c0_13, %c0_14, %c0_15] : memref<8x2x32xf32, #tpu.memory_space<vmem>>, vector<1x2x32xf32>
    %37 = vector.shape_cast %36 : vector<1x2x32xf32> to vector<2x32xf32>
    %38 = vector.shape_cast %35 : vector<2x32xf32> to vector<1x2x32xf32>
    tpu.vector_store %arg6[%c0_13, %c0_14, %c0_15], %38 {strides = array<i32>} : memref<8x2x32xf32, #tpu.memory_space<vmem>>, vector<1x2x32xf32>,
    %39 = vector.extract_strided_slice %6 {offsets = [1, 0, 0], sizes = [1, 2, 96], strides = [1, 1, 1]} : vector<8x2x96xf32> to vector<1x2x96xf32>
    %40 = vector.shape_cast %39 : vector<1x2x96xf32> to vector<2x96xf32>
    %cst_16 = arith.constant dense<0.000000e+00> : vector<2x96xf32>
    %41 = tpu.matmul %35, %7, %cst_16 {dimension_numbers = #tpu.dot_dimension_numbers<[1], [0], [0], [1], [0, 0, 1, 1], [], []>} : vector<2x32xf32>, vector<32x96xf32>, vector<2x96xf32> -> vector<2x96xf32>
    %42 = vector.extract_strided_slice %40 {offsets = [0, 0], sizes = [2, 64], strides = [1, 1]} : vector<2x96xf32> to vector<2x64xf32>
    %43 = vector.extract_strided_slice %41 {offsets = [0, 0], sizes = [2, 64], strides = [1, 1]} : vector<2x96xf32> to vector<2x64xf32>
    %44 = arith.addf %42, %43 : vector<2x64xf32>
    %45 = arith.negf %44 : vector<2x64xf32>
    %46 = math.exp %45 : vector<2x64xf32>
    %cst_17 = arith.constant 1.000000e+00 : f32
    %47 = vector.broadcast %cst_17 : f32 to vector<2x64xf32>
    %48 = arith.addf %47, %46 : vector<2x64xf32>
    %49 = arith.divf %47, %48 : vector<2x64xf32>
    %50 = vector.extract_strided_slice %49 {offsets = [0, 0], sizes = [2, 32], strides = [1, 1]} : vector<2x64xf32> to vector<2x32xf32>
    %51 = vector.extract_strided_slice %49 {offsets = [0, 32], sizes = [2, 32], strides = [1, 1]} : vector<2x64xf32> to vector<2x32xf32>
    %52 = vector.extract_strided_slice %40 {offsets = [0, 64], sizes = [2, 32], strides = [1, 1]} : vector<2x96xf32> to vector<2x32xf32>
    %53 = vector.extract_strided_slice %41 {offsets = [0, 64], sizes = [2, 32], strides = [1, 1]} : vector<2x96xf32> to vector<2x32xf32>
    %54 = arith.addf %53, %10 : vector<2x32xf32>
    %55 = arith.mulf %50, %54 : vector<2x32xf32>
    %56 = arith.addf %52, %55 : vector<2x32xf32>
    %57 = math.tanh %56 : vector<2x32xf32>
    %cst_18 = arith.constant 1.000000e+00 : f32
    %58 = vector.broadcast %cst_18 : f32 to vector<2x32xf32>
    %59 = arith.subf %58, %51 : vector<2x32xf32>
    %60 = arith.mulf %59, %57 : vector<2x32xf32>
    %61 = arith.mulf %51, %35 : vector<2x32xf32>
    %62 = arith.addf %60, %61 : vector<2x32xf32>
    %c1 = arith.constant 1 : index
    %c0_19 = arith.constant 0 : index
    %c0_20 = arith.constant 0 : index
    %63 = vector.load %arg6[%c1, %c0_19, %c0_20] : memref<8x2x32xf32, #tpu.memory_space<vmem>>, vector<1x2x32xf32>
    %64 = vector.shape_cast %63 : vector<1x2x32xf32> to vector<2x32xf32>
    %65 = vector.shape_cast %62 : vector<2x32xf32> to vector<1x2x32xf32>
    tpu.vector_store %arg6[%c1, %c0_19, %c0_20], %65 {strides = array<i32>} : memref<8x2x32xf32, #tpu.memory_space<vmem>>, vector<1x2x32xf32>,
    %66 = vector.extract_strided_slice %6 {offsets = [2, 0, 0], sizes = [1, 2, 96], strides = [1, 1, 1]} : vector<8x2x96xf32> to vector<1x2x96xf32>
    %67 = vector.shape_cast %66 : vector<1x2x96xf32> to vector<2x96xf32>
    %cst_21 = arith.constant dense<0.000000e+00> : vector<2x96xf32>
    %68 = tpu.matmul %62, %7, %cst_21 {dimension_numbers = #tpu.dot_dimension_numbers<[1], [0], [0], [1], [0, 0, 1, 1], [], []>} : vector<2x32xf32>, vector<32x96xf32>, vector<2x96xf32> -> vector<2x96xf32>
    %69 = vector.extract_strided_slice %67 {offsets = [0, 0], sizes = [2, 64], strides = [1, 1]} : vector<2x96xf32> to vector<2x64xf32>
    %70 = vector.extract_strided_slice %68 {offsets = [0, 0], sizes = [2, 64], strides = [1, 1]} : vector<2x96xf32> to vector<2x64xf32>
    %71 = arith.addf %69, %70 : vector<2x64xf32>
    %72 = arith.negf %71 : vector<2x64xf32>
    %73 = math.exp %72 : vector<2x64xf32>
    %cst_22 = arith.constant 1.000000e+00 : f32
    %74 = vector.broadcast %cst_22 : f32 to vector<2x64xf32>
    %75 = arith.addf %74, %73 : vector<2x64xf32>
    %76 = arith.divf %74, %75 : vector<2x64xf32>
    %77 = vector.extract_strided_slice %76 {offsets = [0, 0], sizes = [2, 32], strides = [1, 1]} : vector<2x64xf32> to vector<2x32xf32>
    %78 = vector.extract_strided_slice %76 {offsets = [0, 32], sizes = [2, 32], strides = [1, 1]} : vector<2x64xf32> to vector<2x32xf32>
    %79 = vector.extract_strided_slice %67 {offsets = [0, 64], sizes = [2, 32], strides = [1, 1]} : vector<2x96xf32> to vector<2x32xf32>
    %80 = vector.extract_strided_slice %68 {offsets = [0, 64], sizes = [2, 32], strides = [1, 1]} : vector<2x96xf32> to vector<2x32xf32>
    %81 = arith.addf %80, %10 : vector<2x32xf32>
    %82 = arith.mulf %77, %81 : vector<2x32xf32>
    %83 = arith.addf %79, %82 : vector<2x32xf32>
    %84 = math.tanh %83 : vector<2x32xf32>
    %cst_23 = arith.constant 1.000000e+00 : f32
    %85 = vector.broadcast %cst_23 : f32 to vector<2x32xf32>
    %86 = arith.subf %85, %78 : vector<2x32xf32>
    %87 = arith.mulf %86, %84 : vector<2x32xf32>
    %88 = arith.mulf %78, %62 : vector<2x32xf32>
    %89 = arith.addf %87, %88 : vector<2x32xf32>
    %c2 = arith.constant 2 : index
    %c0_24 = arith.constant 0 : index
    %c0_25 = arith.constant 0 : index
    %90 = vector.load %arg6[%c2, %c0_24, %c0_25] : memref<8x2x32xf32, #tpu.memory_space<vmem>>, vector<1x2x32xf32>
    %91 = vector.shape_cast %90 : vector<1x2x32xf32> to vector<2x32xf32>
    %92 = vector.shape_cast %89 : vector<2x32xf32> to vector<1x2x32xf32>
    tpu.vector_store %arg6[%c2, %c0_24, %c0_25], %92 {strides = array<i32>} : memref<8x2x32xf32, #tpu.memory_space<vmem>>, vector<1x2x32xf32>,
    %93 = vector.extract_strided_slice %6 {offsets = [3, 0, 0], sizes = [1, 2, 96], strides = [1, 1, 1]} : vector<8x2x96xf32> to vector<1x2x96xf32>
    %94 = vector.shape_cast %93 : vector<1x2x96xf32> to vector<2x96xf32>
    %cst_26 = arith.constant dense<0.000000e+00> : vector<2x96xf32>
    %95 = tpu.matmul %89, %7, %cst_26 {dimension_numbers = #tpu.dot_dimension_numbers<[1], [0], [0], [1], [0, 0, 1, 1], [], []>} : vector<2x32xf32>, vector<32x96xf32>, vector<2x96xf32> -> vector<2x96xf32>
    %96 = vector.extract_strided_slice %94 {offsets = [0, 0], sizes = [2, 64], strides = [1, 1]} : vector<2x96xf32> to vector<2x64xf32>
    %97 = vector.extract_strided_slice %95 {offsets = [0, 0], sizes = [2, 64], strides = [1, 1]} : vector<2x96xf32> to vector<2x64xf32>
    %98 = arith.addf %96, %97 : vector<2x64xf32>
    %99 = arith.negf %98 : vector<2x64xf32>
    %100 = math.exp %99 : vector<2x64xf32>
    %cst_27 = arith.constant 1.000000e+00 : f32
    %101 = vector.broadcast %cst_27 : f32 to vector<2x64xf32>
    %102 = arith.addf %101, %100 : vector<2x64xf32>
    %103 = arith.divf %101, %102 : vector<2x64xf32>
    %104 = vector.extract_strided_slice %103 {offsets = [0, 0], sizes = [2, 32], strides = [1, 1]} : vector<2x64xf32> to vector<2x32xf32>
    %105 = vector.extract_strided_slice %103 {offsets = [0, 32], sizes = [2, 32], strides = [1, 1]} : vector<2x64xf32> to vector<2x32xf32>
    %106 = vector.extract_strided_slice %94 {offsets = [0, 64], sizes = [2, 32], strides = [1, 1]} : vector<2x96xf32> to vector<2x32xf32>
    %107 = vector.extract_strided_slice %95 {offsets = [0, 64], sizes = [2, 32], strides = [1, 1]} : vector<2x96xf32> to vector<2x32xf32>
    %108 = arith.addf %107, %10 : vector<2x32xf32>
    %109 = arith.mulf %104, %108 : vector<2x32xf32>
    %110 = arith.addf %106, %109 : vector<2x32xf32>
    %111 = math.tanh %110 : vector<2x32xf32>
    %cst_28 = arith.constant 1.000000e+00 : f32
    %112 = vector.broadcast %cst_28 : f32 to vector<2x32xf32>
    %113 = arith.subf %112, %105 : vector<2x32xf32>
    %114 = arith.mulf %113, %111 : vector<2x32xf32>
    %115 = arith.mulf %105, %89 : vector<2x32xf32>
    %116 = arith.addf %114, %115 : vector<2x32xf32>
    %c3 = arith.constant 3 : index
    %c0_29 = arith.constant 0 : index
    %c0_30 = arith.constant 0 : index
    %117 = vector.load %arg6[%c3, %c0_29, %c0_30] : memref<8x2x32xf32, #tpu.memory_space<vmem>>, vector<1x2x32xf32>
    %118 = vector.shape_cast %117 : vector<1x2x32xf32> to vector<2x32xf32>
    %119 = vector.shape_cast %116 : vector<2x32xf32> to vector<1x2x32xf32>
    tpu.vector_store %arg6[%c3, %c0_29, %c0_30], %119 {strides = array<i32>} : memref<8x2x32xf32, #tpu.memory_space<vmem>>, vector<1x2x32xf32>,
    %120 = vector.extract_strided_slice %6 {offsets = [4, 0, 0], sizes = [1, 2, 96], strides = [1, 1, 1]} : vector<8x2x96xf32> to vector<1x2x96xf32>
    %121 = vector.shape_cast %120 : vector<1x2x96xf32> to vector<2x96xf32>
    %cst_31 = arith.constant dense<0.000000e+00> : vector<2x96xf32>
    %122 = tpu.matmul %116, %7, %cst_31 {dimension_numbers = #tpu.dot_dimension_numbers<[1], [0], [0], [1], [0, 0, 1, 1], [], []>} : vector<2x32xf32>, vector<32x96xf32>, vector<2x96xf32> -> vector<2x96xf32>
    %123 = vector.extract_strided_slice %121 {offsets = [0, 0], sizes = [2, 64], strides = [1, 1]} : vector<2x96xf32> to vector<2x64xf32>
    %124 = vector.extract_strided_slice %122 {offsets = [0, 0], sizes = [2, 64], strides = [1, 1]} : vector<2x96xf32> to vector<2x64xf32>
    %125 = arith.addf %123, %124 : vector<2x64xf32>
    %126 = arith.negf %125 : vector<2x64xf32>
    %127 = math.exp %126 : vector<2x64xf32>
    %cst_32 = arith.constant 1.000000e+00 : f32
    %128 = vector.broadcast %cst_32 : f32 to vector<2x64xf32>
    %129 = arith.addf %128, %127 : vector<2x64xf32>
    %130 = arith.divf %128, %129 : vector<2x64xf32>
    %131 = vector.extract_strided_slice %130 {offsets = [0, 0], sizes = [2, 32], strides = [1, 1]} : vector<2x64xf32> to vector<2x32xf32>
    %132 = vector.extract_strided_slice %130 {offsets = [0, 32], sizes = [2, 32], strides = [1, 1]} : vector<2x64xf32> to vector<2x32xf32>
    %133 = vector.extract_strided_slice %121 {offsets = [0, 64], sizes = [2, 32], strides = [1, 1]} : vector<2x96xf32> to vector<2x32xf32>
    %134 = vector.extract_strided_slice %122 {offsets = [0, 64], sizes = [2, 32], strides = [1, 1]} : vector<2x96xf32> to vector<2x32xf32>
    %135 = arith.addf %134, %10 : vector<2x32xf32>
    %136 = arith.mulf %131, %135 : vector<2x32xf32>
    %137 = arith.addf %133, %136 : vector<2x32xf32>
    %138 = math.tanh %137 : vector<2x32xf32>
    %cst_33 = arith.constant 1.000000e+00 : f32
    %139 = vector.broadcast %cst_33 : f32 to vector<2x32xf32>
    %140 = arith.subf %139, %132 : vector<2x32xf32>
    %141 = arith.mulf %140, %138 : vector<2x32xf32>
    %142 = arith.mulf %132, %116 : vector<2x32xf32>
    %143 = arith.addf %141, %142 : vector<2x32xf32>
    %c4 = arith.constant 4 : index
    %c0_34 = arith.constant 0 : index
    %c0_35 = arith.constant 0 : index
    %144 = vector.load %arg6[%c4, %c0_34, %c0_35] : memref<8x2x32xf32, #tpu.memory_space<vmem>>, vector<1x2x32xf32>
    %145 = vector.shape_cast %144 : vector<1x2x32xf32> to vector<2x32xf32>
    %146 = vector.shape_cast %143 : vector<2x32xf32> to vector<1x2x32xf32>
    tpu.vector_store %arg6[%c4, %c0_34, %c0_35], %146 {strides = array<i32>} : memref<8x2x32xf32, #tpu.memory_space<vmem>>, vector<1x2x32xf32>,
    %147 = vector.extract_strided_slice %6 {offsets = [5, 0, 0], sizes = [1, 2, 96], strides = [1, 1, 1]} : vector<8x2x96xf32> to vector<1x2x96xf32>
    %148 = vector.shape_cast %147 : vector<1x2x96xf32> to vector<2x96xf32>
    %cst_36 = arith.constant dense<0.000000e+00> : vector<2x96xf32>
    %149 = tpu.matmul %143, %7, %cst_36 {dimension_numbers = #tpu.dot_dimension_numbers<[1], [0], [0], [1], [0, 0, 1, 1], [], []>} : vector<2x32xf32>, vector<32x96xf32>, vector<2x96xf32> -> vector<2x96xf32>
    %150 = vector.extract_strided_slice %148 {offsets = [0, 0], sizes = [2, 64], strides = [1, 1]} : vector<2x96xf32> to vector<2x64xf32>
    %151 = vector.extract_strided_slice %149 {offsets = [0, 0], sizes = [2, 64], strides = [1, 1]} : vector<2x96xf32> to vector<2x64xf32>
    %152 = arith.addf %150, %151 : vector<2x64xf32>
    %153 = arith.negf %152 : vector<2x64xf32>
    %154 = math.exp %153 : vector<2x64xf32>
    %cst_37 = arith.constant 1.000000e+00 : f32
    %155 = vector.broadcast %cst_37 : f32 to vector<2x64xf32>
    %156 = arith.addf %155, %154 : vector<2x64xf32>
    %157 = arith.divf %155, %156 : vector<2x64xf32>
    %158 = vector.extract_strided_slice %157 {offsets = [0, 0], sizes = [2, 32], strides = [1, 1]} : vector<2x64xf32> to vector<2x32xf32>
    %159 = vector.extract_strided_slice %157 {offsets = [0, 32], sizes = [2, 32], strides = [1, 1]} : vector<2x64xf32> to vector<2x32xf32>
    %160 = vector.extract_strided_slice %148 {offsets = [0, 64], sizes = [2, 32], strides = [1, 1]} : vector<2x96xf32> to vector<2x32xf32>
    %161 = vector.extract_strided_slice %149 {offsets = [0, 64], sizes = [2, 32], strides = [1, 1]} : vector<2x96xf32> to vector<2x32xf32>
    %162 = arith.addf %161, %10 : vector<2x32xf32>
    %163 = arith.mulf %158, %162 : vector<2x32xf32>
    %164 = arith.addf %160, %163 : vector<2x32xf32>
    %165 = math.tanh %164 : vector<2x32xf32>
    %cst_38 = arith.constant 1.000000e+00 : f32
    %166 = vector.broadcast %cst_38 : f32 to vector<2x32xf32>
    %167 = arith.subf %166, %159 : vector<2x32xf32>
    %168 = arith.mulf %167, %165 : vector<2x32xf32>
    %169 = arith.mulf %159, %143 : vector<2x32xf32>
    %170 = arith.addf %168, %169 : vector<2x32xf32>
    %c5 = arith.constant 5 : index
    %c0_39 = arith.constant 0 : index
    %c0_40 = arith.constant 0 : index
    %171 = vector.load %arg6[%c5, %c0_39, %c0_40] : memref<8x2x32xf32, #tpu.memory_space<vmem>>, vector<1x2x32xf32>
    %172 = vector.shape_cast %171 : vector<1x2x32xf32> to vector<2x32xf32>
    %173 = vector.shape_cast %170 : vector<2x32xf32> to vector<1x2x32xf32>
    tpu.vector_store %arg6[%c5, %c0_39, %c0_40], %173 {strides = array<i32>} : memref<8x2x32xf32, #tpu.memory_space<vmem>>, vector<1x2x32xf32>,
    %174 = vector.extract_strided_slice %6 {offsets = [6, 0, 0], sizes = [1, 2, 96], strides = [1, 1, 1]} : vector<8x2x96xf32> to vector<1x2x96xf32>
    %175 = vector.shape_cast %174 : vector<1x2x96xf32> to vector<2x96xf32>
    %cst_41 = arith.constant dense<0.000000e+00> : vector<2x96xf32>
    %176 = tpu.matmul %170, %7, %cst_41 {dimension_numbers = #tpu.dot_dimension_numbers<[1], [0], [0], [1], [0, 0, 1, 1], [], []>} : vector<2x32xf32>, vector<32x96xf32>, vector<2x96xf32> -> vector<2x96xf32>
    %177 = vector.extract_strided_slice %175 {offsets = [0, 0], sizes = [2, 64], strides = [1, 1]} : vector<2x96xf32> to vector<2x64xf32>
    %178 = vector.extract_strided_slice %176 {offsets = [0, 0], sizes = [2, 64], strides = [1, 1]} : vector<2x96xf32> to vector<2x64xf32>
    %179 = arith.addf %177, %178 : vector<2x64xf32>
    %180 = arith.negf %179 : vector<2x64xf32>
    %181 = math.exp %180 : vector<2x64xf32>
    %cst_42 = arith.constant 1.000000e+00 : f32
    %182 = vector.broadcast %cst_42 : f32 to vector<2x64xf32>
    %183 = arith.addf %182, %181 : vector<2x64xf32>
    %184 = arith.divf %182, %183 : vector<2x64xf32>
    %185 = vector.extract_strided_slice %184 {offsets = [0, 0], sizes = [2, 32], strides = [1, 1]} : vector<2x64xf32> to vector<2x32xf32>
    %186 = vector.extract_strided_slice %184 {offsets = [0, 32], sizes = [2, 32], strides = [1, 1]} : vector<2x64xf32> to vector<2x32xf32>
    %187 = vector.extract_strided_slice %175 {offsets = [0, 64], sizes = [2, 32], strides = [1, 1]} : vector<2x96xf32> to vector<2x32xf32>
    %188 = vector.extract_strided_slice %176 {offsets = [0, 64], sizes = [2, 32], strides = [1, 1]} : vector<2x96xf32> to vector<2x32xf32>
    %189 = arith.addf %188, %10 : vector<2x32xf32>
    %190 = arith.mulf %185, %189 : vector<2x32xf32>
    %191 = arith.addf %187, %190 : vector<2x32xf32>
    %192 = math.tanh %191 : vector<2x32xf32>
    %cst_43 = arith.constant 1.000000e+00 : f32
    %193 = vector.broadcast %cst_43 : f32 to vector<2x32xf32>
    %194 = arith.subf %193, %186 : vector<2x32xf32>
    %195 = arith.mulf %194, %192 : vector<2x32xf32>
    %196 = arith.mulf %186, %170 : vector<2x32xf32>
    %197 = arith.addf %195, %196 : vector<2x32xf32>
    %c6 = arith.constant 6 : index
    %c0_44 = arith.constant 0 : index
    %c0_45 = arith.constant 0 : index
    %198 = vector.load %arg6[%c6, %c0_44, %c0_45] : memref<8x2x32xf32, #tpu.memory_space<vmem>>, vector<1x2x32xf32>
    %199 = vector.shape_cast %198 : vector<1x2x32xf32> to vector<2x32xf32>
    %200 = vector.shape_cast %197 : vector<2x32xf32> to vector<1x2x32xf32>
    tpu.vector_store %arg6[%c6, %c0_44, %c0_45], %200 {strides = array<i32>} : memref<8x2x32xf32, #tpu.memory_space<vmem>>, vector<1x2x32xf32>,
    %201 = vector.extract_strided_slice %6 {offsets = [7, 0, 0], sizes = [1, 2, 96], strides = [1, 1, 1]} : vector<8x2x96xf32> to vector<1x2x96xf32>
    %202 = vector.shape_cast %201 : vector<1x2x96xf32> to vector<2x96xf32>
    %cst_46 = arith.constant dense<0.000000e+00> : vector<2x96xf32>
    %203 = tpu.matmul %197, %7, %cst_46 {dimension_numbers = #tpu.dot_dimension_numbers<[1], [0], [0], [1], [0, 0, 1, 1], [], []>} : vector<2x32xf32>, vector<32x96xf32>, vector<2x96xf32> -> vector<2x96xf32>
    %204 = vector.extract_strided_slice %202 {offsets = [0, 0], sizes = [2, 64], strides = [1, 1]} : vector<2x96xf32> to vector<2x64xf32>
    %205 = vector.extract_strided_slice %203 {offsets = [0, 0], sizes = [2, 64], strides = [1, 1]} : vector<2x96xf32> to vector<2x64xf32>
    %206 = arith.addf %204, %205 : vector<2x64xf32>
    %207 = arith.negf %206 : vector<2x64xf32>
    %208 = math.exp %207 : vector<2x64xf32>
    %cst_47 = arith.constant 1.000000e+00 : f32
    %209 = vector.broadcast %cst_47 : f32 to vector<2x64xf32>
    %210 = arith.addf %209, %208 : vector<2x64xf32>
    %211 = arith.divf %209, %210 : vector<2x64xf32>
    %212 = vector.extract_strided_slice %211 {offsets = [0, 0], sizes = [2, 32], strides = [1, 1]} : vector<2x64xf32> to vector<2x32xf32>
    %213 = vector.extract_strided_slice %211 {offsets = [0, 32], sizes = [2, 32], strides = [1, 1]} : vector<2x64xf32> to vector<2x32xf32>
    %214 = vector.extract_strided_slice %202 {offsets = [0, 64], sizes = [2, 32], strides = [1, 1]} : vector<2x96xf32> to vector<2x32xf32>
    %215 = vector.extract_strided_slice %203 {offsets = [0, 64], sizes = [2, 32], strides = [1, 1]} : vector<2x96xf32> to vector<2x32xf32>
    %216 = arith.addf %215, %10 : vector<2x32xf32>
    %217 = arith.mulf %212, %216 : vector<2x32xf32>
    %218 = arith.addf %214, %217 : vector<2x32xf32>
    %219 = math.tanh %218 : vector<2x32xf32>
    %cst_48 = arith.constant 1.000000e+00 : f32
    %220 = vector.broadcast %cst_48 : f32 to vector<2x32xf32>
    %221 = arith.subf %220, %213 : vector<2x32xf32>
    %222 = arith.mulf %221, %219 : vector<2x32xf32>
    %223 = arith.mulf %213, %197 : vector<2x32xf32>
    %224 = arith.addf %222, %223 : vector<2x32xf32>
    %c7 = arith.constant 7 : index
    %c0_49 = arith.constant 0 : index
    %c0_50 = arith.constant 0 : index
    %225 = vector.load %arg6[%c7, %c0_49, %c0_50] : memref<8x2x32xf32, #tpu.memory_space<vmem>>, vector<1x2x32xf32>
    %226 = vector.shape_cast %225 : vector<1x2x32xf32> to vector<2x32xf32>
    %227 = vector.shape_cast %224 : vector<2x32xf32> to vector<1x2x32xf32>
    tpu.vector_store %arg6[%c7, %c0_49, %c0_50], %227 {strides = array<i32>} : memref<8x2x32xf32, #tpu.memory_space<vmem>>, vector<1x2x32xf32>,
    return
  }
  func.func @transform_0(%arg0: i32) -> (i32, i32) {
    %c0_i32 = arith.constant 0 : i32
    %c0_i32_0 = arith.constant 0 : i32
    %c0_i32_1 = arith.constant 0 : i32
    return %c0_i32, %c0_i32_0 : i32, i32
  }
  func.func @transform_1(%arg0: i32) -> (i32, i32) {
    %c0_i32 = arith.constant 0 : i32
    %c0_i32_0 = arith.constant 0 : i32
    %c0_i32_1 = arith.constant 0 : i32
    return %c0_i32, %c0_i32_0 : i32, i32
  }
  func.func @transform_2(%arg0: i32) -> (i32, i32) {
    %c0_i32 = arith.constant 0 : i32
    %c0_i32_0 = arith.constant 0 : i32
    %c0_i32_1 = arith.constant 0 : i32
    return %c0_i32, %c0_i32_0 : i32, i32
  }
  func.func @transform_3(%arg0: i32) -> (i32, i32) {
    %c0_i32 = arith.constant 0 : i32
    %c0_i32_0 = arith.constant 0 : i32
    %c0_i32_1 = arith.constant 0 : i32
    return %c0_i32, %c0_i32_0 : i32, i32
  }
  func.func @transform_4(%arg0: i32) -> (i32, i32) {
    %c0_i32 = arith.constant 0 : i32
    %c0_i32_0 = arith.constant 0 : i32
    %c0_i32_1 = arith.constant 0 : i32
    return %c0_i32, %c0_i32_0 : i32, i32
  }
  func.func @transform_5(%arg0: i32) -> (i32, i32, i32) {
    %c0_i32 = arith.constant 0 : i32
    %c0_i32_0 = arith.constant 0 : i32
    %c0_i32_1 = arith.constant 0 : i32
    %c0_i32_2 = arith.constant 0 : i32
    return %c0_i32, %c0_i32_0, %c0_i32_1 : i32, i32, i32
  }
}

</mosaic_0001>

<bundles_post_ra>
// kernel: encoder_ptr_gru.1
= control target key start
LH: loop header
LB: loop body
LE: loop exit
PB: predicated region body
PF: predicated region fallthrough
CT: control target
= control target key end

     0   :  { %vm37_vm0 = vcmask 1043456   ;;  %vm30_vm1 = vcmask 31744   ;;  %v1396_v0 = vmov 0.0|0.0   ;;  %vm1397_vm2 = vmmov 0   ;;  %s1630_s1 = inlined_call_operand.vmem [shape: f32[4,96], index: 1, kind: input, shape index: {}]   ;;  %s1631_s2 = inlined_call_operand.vmem [shape: f32[32,96], index: 2, kind: input, shape index: {}]   ;;  %s1632_s0 = inlined_call_operand.vmem [shape: f32[16,4], index: 0, kind: input, shape index: {}]   ;;  %s1633_s4 = inlined_call_operand.vmem [shape: f32[1,32], index: 4, kind: input, shape index: {}]   ;;  %s1634_s3 = inlined_call_operand.vmem [shape: f32[1,96], index: 3, kind: input, shape index: {}]   ;;  %s1635_s5 = inlined_call_operand.vmem [shape: f32[8,2,32], index: 5, kind: output, shape index: {}]  }
   0x1   :  { %1294 = vmatprep.subr.bf16.mxu1 %v1396_v0  ;;  %v22_v1 = vld [vmem:[%s1630_s1] sm:$0xf]  ;;  %v161_v3 = vld [vmem:[%s1631_s2 + $0x8] sm:$0xff]  ;;  %v162_v7 = vld [vmem:[%s1631_s2 + $0x10] sm:$0xff]  ;;  %v1398_v8 = vmov 0.0   ;;  %v122_v16 = vlaneseq  ;;  %vm292_vm3 = vcmask 254976  }
   0x2   :  { %v160_v2 = vld [vmem:[%s1631_s2] sm:$0xff]  ;;  %1201 = vmatprep.subr.msk.mxu0 %vm37_vm0, %v22_v1  ;;  %v21_v6 = vld [vmem:[%s1632_s0 + $0x8] sm:$0xff]  ;;  %1214 = vmatprep.mubr.msk.f32.mxu1 %vm1397_vm2, %v1398_v8  ;;  %v163_v9 = vld [vmem:[%s1631_s2 + $0x18] sm:$0xff]  ;;  %v1400_v14 = vmov 1983009808   ;;  %vm170_vm4 = vcmask 261120  }
   0x3   :  { %v1443_v4 = vpack.c.bf16 %v161_v3, %v160_v2  ;;  %v20_v5 = vld [vmem:[%s1632_s0] sm:$0xff]  ;;  %1202 = vmatpush3.msk.msra.mxu0 %vm37_vm0, %v22_v1  ;;  %v1466_v11 = vpack.c.bf16 %v163_v9, %v162_v7  ;;  %s1399_s0 = smov 64   ;;  %v120_v15 = vunpack.c.l.s4 %v1400_v14  ;;  %v123_v20 = vshrl.u32 %v122_v16, 7 }
   0x4   :  { %1203 = vmatprep.mubr.msk.f32.mxu0 %vm30_vm1, %v20_v5  ;;  %v1135_v10 = vld [vmem:[%s1633_s4] ss:$0 sm:$0xff]  ;;  %1300 = vmatprep.subr.bf16.mxu0 %v1396_v0 }
   0x5   :  { %1296 = vmatpush3.bf16.msra.mxu1 %v1443_v4  ;;  %1204 = vmatmul.mubr.msk.f32.vlgmr.msra.gmra.mrb[0].mxu0 %vm30_vm1, %v21_v6  ;;  %v1131_v13 = vld [vmem:[%s1634_s3] ss:$0 sm:$0xff]  ;;  %v121_v19 = vunpack.c.0.s8 %v120_v15  ;;  %s1401_s3 = smov 96  }
   0x6   :  { %1297 = vmatprep.subr.bf16.mxu1 %v1396_v0  ;;  %251 = vrot.lane.b32.xlu0 %v1135_v10, %s1399_s0 }
   0x7   :  { %1225 = vmatprep.mubr.msk.f32.mxu0 %vm1397_vm2, %v1398_v8  ;;  %1302 = vmatpush3.bf16.msra.mxu0 %v1443_v4  ;;  %v1493_v23 = vsub.s32 %v121_v19, %v123_v20 }
   0x8   :  { %1303 = vmatprep.subr.bf16.mxu0 %v1396_v0 }
   0x9   :  { %1299 = vmatpush3.bf16.msra.mxu1 %v1466_v11 }
   0xa   :  { %1306 = vmatprep.subr.bf16.mxu1 %v1396_v0 }
   0xb   :  { %1305 = vmatpush3.bf16.msra.mxu0 %v1466_v11 }
   0xc   :  { %1215 = vmatmul.mubr.f32.vlgmr.msra.gmra.mrb[0].mxu1 %v1398_v8  ;;  %1312 = vmatprep.subr.bf16.mxu0 %v1396_v0 }
   0xd   :  { %1308 = vmatpush3.bf16.msra.mxu1 %v1443_v4  ;;  %1236 = vmatprep.mubr.msk.f32.mxu1 %vm1397_vm2, %v1398_v8 }
   0xe   :  { %1309 = vmatprep.subr.bf16.mxu1 %v1396_v0 }
  0x11   :  { %1311 = vmatpush3.bf16.msra.mxu1 %v1466_v11 }
  0x12   :  { %1318 = vmatprep.subr.bf16.mxu1 %v1396_v0 }
  0x78   :  { %v1491_v21 = vpop.permute.xlu0 %251 }
  0xd8   :  { %v1205_v12 = vpop.f32.mrb[0].mxu0 }
  0xd9   :  { %v1489_v17 = vadd.f32 %v1205_v12, %v1131_v13  ;;  %v107_v18 = vpop.f32.mrb[1].mxu0 }
  0xda   :  { %v1498_v27 = vadd.f32 %v1131_v13, %v107_v18 }
  0xdc   :  { %v125_v28 = vrot.slane %v1498_v27, %v1493_v23  ;;  %v118_v12 = vcombine.high %v1498_v27, %v1498_v27 }
  0xde   :  { %v133_v50 = vcombine.high %v125_v28, %v125_v28  ;;  %v132_v13 = vrot.slane %v118_v12, %v1493_v23 }
  0xdf   :  { %v240_v22 = vpop.f32.mrb[0].mxu1 }
  0xe0   :  { %v254_v24 = vadd.f32 %v1491_v21, %v240_v22  ;;  %v1216_v25 = vpop.f32.mrb[1].mxu1  ;;  %v244_v29 = vadd.f32 %v240_v22, %v125_v28 }
  0xe2   :  { %v262_v26 = vrot.slane %v254_v24, %v1493_v23  ;;  %v1136_v30 = vmul.f32 -1.442695, %v244_v29 }
  0xe4   :  { %263 = vrot.lane.b32.xlu0 %v262_v26, %s1399_s0  ;;  %1348 = vpow2.f32 %v1136_v30 }
  0xee   :  { %v1349_v31 = vpop.eup %1348 }
  0xef   :  { %v248_v32 = vadd.f32 1.0, %v1349_v31 }
  0xf1   :  { %1350 = vrcp.f32 %v248_v32 }
  0xfb   :  { %v1351_v33 = vpop.eup %1350 }
  0xfc   :  { %v273_v39 = vsub.f32 1.0, %v1351_v33  ;;  %v279_v41 = vmul.f32 0.0, %v1351_v33 }
 0x156   :  { %v264_v34 = vpop.permute.xlu0 %263 }
 0x157   :  { %v266_v35 = vmul.f32 %v1351_v33, %v264_v34 }
 0x159   :  { %268 = vrot.lane.b32.xlu1 %v266_v35, %s1399_s0 }
 0x1cb   :  { %v269_v36 = vpop.permute.xlu1 %268 }
 0x1cc   :  { %v271_v37 = vadd.f32 %v269_v36, %v125_v28 }
 0x1ce   :  { %1352 = vtanh.f32 %v271_v37 }
 0x1d8   :  { %v1353_v38 = vpop.eup %1352 }
 0x1d9   :  { %275 = vrot.lane.b32.xlu1 %v1353_v38, %s1401_s3  ;;  %v134_v38 = vcombine.high %v132_v13, %v132_v13 }
 0x24b   :  { %v276_v40 = vpop.permute.xlu1 %275 }
 0x24c   :  { %v278_v42 = vmul.f32 %v276_v40, %v273_v39 }
 0x24e   :  { %v280_v43 = vadd.f32 %v279_v41, %v278_v42 }
 0x250   :  { %v288_v44 = vrot.slane %v280_v43, %v1493_v23 }
 0x252   :  { %289 = vrot.lane.b32.xlu0 %v288_v44, %s1401_s3 }
 0x2c4   :  { %v290_v45 = vpop.permute.xlu0 %289 }
 0x2c5   :  { %293 = vst.msk [vmem:[%s1635_s5] sm:$0x3] %vm292_vm3, %v290_v45  ;;  %1226 = vmatmul.mubr.msk.f32.vlgmr.msra.gmra.mrb[2].mxu0 %vm170_vm4, %v290_v45 }
 0x2c6   :  { %1314 = vmatpush3.bf16.msra.mxu0 %v1443_v4  ;;  %1247 = vmatprep.mubr.msk.f32.mxu0 %vm1397_vm2, %v1398_v8 }
 0x2c7   :  { %1315 = vmatprep.subr.bf16.mxu0 %v1396_v0 }
 0x2ca   :  { %1317 = vmatpush3.bf16.msra.mxu0 %v1466_v11 }
 0x2cb   :  { %1324 = vmatprep.subr.bf16.mxu0 %v1396_v0 }
 0x398   :  { %v362_v46 = vpop.f32.mrb[2].mxu0 }
 0x399   :  { %v373_v47 = vadd.f32 %v362_v46, %v1491_v21  ;;  %v1227_v48 = vpop.f32.mrb[3].mxu0  ;;  %v366_v51 = vadd.f32 %v362_v46, %v133_v50 }
 0x39b   :  { %v381_v49 = vrot.slane %v373_v47, %v1493_v23  ;;  %v1138_v52 = vmul.f32 -1.442695, %v366_v51 }
 0x39d   :  { %382 = vrot.lane.b32.xlu1 %v381_v49, %s1399_s0  ;;  %1354 = vpow2.f32 %v1138_v52 }
 0x3a7   :  { %v1355_v53 = vpop.eup %1354 }
 0x3a8   :  { %v370_v54 = vadd.f32 1.0, %v1355_v53 }
 0x3aa   :  { %1356 = vrcp.f32 %v370_v54 }
 0x3b4   :  { %v1357_v55 = vpop.eup %1356 }
 0x3b5   :  { %v392_v61 = vsub.f32 1.0, %v1357_v55  ;;  %v398_v63 = vmul.f32 %v1357_v55, %v280_v43 }
 0x40f   :  { %v383_v56 = vpop.permute.xlu1 %382 }
 0x410   :  { %v385_v57 = vmul.f32 %v1357_v55, %v383_v56 }
 0x412   :  { %387 = vrot.lane.b32.xlu0 %v385_v57, %s1399_s0 }
 0x484   :  { %v388_v58 = vpop.permute.xlu0 %387 }
 0x485   :  { %v390_v59 = vadd.f32 %v388_v58, %v133_v50 }
 0x487   :  { %1358 = vtanh.f32 %v390_v59 }
 0x491   :  { %v1359_v60 = vpop.eup %1358 }
 0x492   :  { %394 = vrot.lane.b32.xlu1 %v1359_v60, %s1401_s3  ;;  %v142_v60 = vrot.slane %v1489_v17, %v1493_v23 }
 0x504   :  { %v395_v62 = vpop.permute.xlu1 %394 }
 0x505   :  { %v397_v1 = vmul.f32 %v395_v62, %v392_v61 }
 0x507   :  { %v399_v2 = vadd.f32 %v398_v63, %v397_v1 }
 0x509   :  { %v407_v3 = vrot.slane %v399_v2, %v1493_v23 }
 0x50b   :  { %408 = vrot.lane.b32.xlu0 %v407_v3, %s1401_s3 }
 0x57d   :  { %v409_v5 = vpop.permute.xlu0 %408 }
 0x57e   :  { %1139 = vst.msk [vmem:[%s1635_s5 + $0x2] sm:$0x3] %vm292_vm3, %v409_v5  ;;  %1237 = vmatmul.mubr.msk.f32.vlgmr.msra.gmra.mrb[2].mxu1 %vm170_vm4, %v409_v5 }
 0x57f   :  { %1320 = vmatpush3.bf16.msra.mxu1 %v1443_v4  ;;  %1258 = vmatprep.mubr.msk.f32.mxu1 %vm1397_vm2, %v1398_v8 }
 0x580   :  { %1321 = vmatprep.subr.bf16.mxu1 %v1396_v0 }
 0x583   :  { %1323 = vmatpush3.bf16.msra.mxu1 %v1466_v11 }
 0x584   :  { %1330 = vmatprep.subr.bf16.mxu1 %v1396_v0 }
 0x651   :  { %v481_v6 = vpop.f32.mrb[2].mxu1 }
 0x652   :  { %v492_v7 = vadd.f32 %v481_v6, %v1491_v21  ;;  %v1238_v9 = vpop.f32.mrb[3].mxu1  ;;  %v485_v14 = vadd.f32 %v481_v6, %v132_v13 }
 0x654   :  { %v500_v10 = vrot.slane %v492_v7, %v1493_v23  ;;  %v1141_v15 = vmul.f32 -1.442695, %v485_v14 }
 0x656   :  { %501 = vrot.lane.b32.xlu1 %v500_v10, %s1399_s0  ;;  %1360 = vpow2.f32 %v1141_v15 }
 0x660   :  { %v1361_v16 = vpop.eup %1360 }
 0x661   :  { %v489_v18 = vadd.f32 1.0, %v1361_v16 }
 0x663   :  { %1362 = vrcp.f32 %v489_v18 }
 0x66d   :  { %v1363_v19 = vpop.eup %1362 }
 0x66e   :  { %v511_v27 = vsub.f32 1.0, %v1363_v19  ;;  %v517_v29 = vmul.f32 %v1363_v19, %v399_v2 }
 0x6c8   :  { %v502_v20 = vpop.permute.xlu1 %501 }
 0x6c9   :  { %v504_v22 = vmul.f32 %v1363_v19, %v502_v20 }
 0x6cb   :  { %506 = vrot.lane.b32.xlu0 %v504_v22, %s1399_s0 }
 0x73d   :  { %v507_v24 = vpop.permute.xlu0 %506 }
 0x73e   :  { %v509_v25 = vadd.f32 %v507_v24, %v132_v13 }
 0x740   :  { %1364 = vtanh.f32 %v509_v25  ;;  %v150_v25 = vcombine.high %v142_v60, %v142_v60 }
 0x74a   :  { %v1365_v26 = vpop.eup %1364 }
 0x74b   :  { %513 = vrot.lane.b32.xlu1 %v1365_v26, %s1401_s3 }
 0x7bd   :  { %v514_v28 = vpop.permute.xlu1 %513 }
 0x7be   :  { %v516_v30 = vmul.f32 %v514_v28, %v511_v27 }
 0x7c0   :  { %v518_v31 = vadd.f32 %v517_v29, %v516_v30 }
 0x7c2   :  { %v526_v32 = vrot.slane %v518_v31, %v1493_v23 }
 0x7c4   :  { %527 = vrot.lane.b32.xlu0 %v526_v32, %s1401_s3 }
 0x836   :  { %v528_v33 = vpop.permute.xlu0 %527 }
 0x837   :  { %1142 = vst.msk [vmem:[%s1635_s5 + $0x4] sm:$0x3] %vm292_vm3, %v528_v33  ;;  %1248 = vmatmul.mubr.msk.f32.vlgmr.msra.gmra.mrb[4].mxu0 %vm170_vm4, %v528_v33 }
 0x838   :  { %1326 = vmatpush3.bf16.msra.mxu0 %v1443_v4  ;;  %1269 = vmatprep.mubr.msk.f32.mxu0 %vm1397_vm2, %v1398_v8 }
 0x839   :  { %1327 = vmatprep.subr.bf16.mxu0 %v1396_v0 }
 0x83c   :  { %1329 = vmatpush3.bf16.msra.mxu0 %v1466_v11 }
 0x83d   :  { %1336 = vmatprep.subr.bf16.mxu0 %v1396_v0 }
 0x90a   :  { %v600_v34 = vpop.f32.mrb[4].mxu0 }
 0x90b   :  { %v611_v35 = vadd.f32 %v600_v34, %v1491_v21  ;;  %v1249_v36 = vpop.f32.mrb[5].mxu0  ;;  %v604_v39 = vadd.f32 %v600_v34, %v134_v38 }
 0x90d   :  { %v619_v37 = vrot.slane %v611_v35, %v1493_v23  ;;  %v1144_v40 = vmul.f32 -1.442695, %v604_v39 }
 0x90f   :  { %620 = vrot.lane.b32.xlu1 %v619_v37, %s1399_s0  ;;  %1366 = vpow2.f32 %v1144_v40 }
 0x919   :  { %v1367_v41 = vpop.eup %1366 }
 0x91a   :  { %v608_v42 = vadd.f32 1.0, %v1367_v41 }
 0x91c   :  { %1368 = vrcp.f32 %v608_v42 }
 0x926   :  { %v1369_v43 = vpop.eup %1368 }
 0x927   :  { %v630_v49 = vsub.f32 1.0, %v1369_v43  ;;  %v636_v51 = vmul.f32 %v1369_v43, %v518_v31 }
 0x981   :  { %v621_v44 = vpop.permute.xlu1 %620 }
 0x982   :  { %v623_v45 = vmul.f32 %v1369_v43, %v621_v44  ;;  %v135_v43 = vcombine.high %v1489_v17, %v1489_v17 }
 0x984   :  { %625 = vrot.lane.b32.xlu0 %v623_v45, %s1399_s0  ;;  %v149_v44 = vrot.slane %v135_v43, %v1493_v23 }
 0x9f6   :  { %v626_v46 = vpop.permute.xlu0 %625 }
 0x9f7   :  { %v628_v47 = vadd.f32 %v626_v46, %v134_v38 }
 0x9f9   :  { %1370 = vtanh.f32 %v628_v47 }
 0xa03   :  { %v1371_v48 = vpop.eup %1370 }
 0xa04   :  { %632 = vrot.lane.b32.xlu1 %v1371_v48, %s1401_s3 }
 0xa76   :  { %v633_v50 = vpop.permute.xlu1 %632 }
 0xa77   :  { %v635_v52 = vmul.f32 %v633_v50, %v630_v49 }
 0xa79   :  { %v637_v53 = vadd.f32 %v636_v51, %v635_v52 }
 0xa7b   :  { %v645_v54 = vrot.slane %v637_v53, %v1493_v23 }
 0xa7d   :  { %646 = vrot.lane.b32.xlu0 %v645_v54, %s1401_s3 }
 0xaef   :  { %v647_v55 = vpop.permute.xlu0 %646 }
 0xaf0   :  { %1145 = vst.msk [vmem:[%s1635_s5 + $0x6] sm:$0x3] %vm292_vm3, %v647_v55  ;;  %1259 = vmatmul.mubr.msk.f32.vlgmr.msra.gmra.mrb[4].mxu1 %vm170_vm4, %v647_v55 }
 0xaf1   :  { %1332 = vmatpush3.bf16.msra.mxu1 %v1443_v4  ;;  %1280 = vmatprep.mubr.msk.f32.mxu1 %vm1397_vm2, %v1398_v8 }
 0xaf2   :  { %1333 = vmatprep.subr.bf16.mxu1 %v1396_v0 }
 0xaf5   :  { %1335 = vmatpush3.bf16.msra.mxu1 %v1466_v11 }
 0xbc3   :  { %v719_v56 = vpop.f32.mrb[4].mxu1 }
 0xbc4   :  { %v730_v57 = vadd.f32 %v719_v56, %v1491_v21  ;;  %v1260_v58 = vpop.f32.mrb[5].mxu1  ;;  %v723_v61 = vadd.f32 %v719_v56, %v142_v60 }
 0xbc6   :  { %v738_v59 = vrot.slane %v730_v57, %v1493_v23  ;;  %v1147_v62 = vmul.f32 -1.442695, %v723_v61 }
 0xbc8   :  { %739 = vrot.lane.b32.xlu1 %v738_v59, %s1399_s0  ;;  %1372 = vpow2.f32 %v1147_v62 }
 0xbd2   :  { %v1373_v63 = vpop.eup %1372 }
 0xbd3   :  { %v727_v1 = vadd.f32 1.0, %v1373_v63 }
 0xbd5   :  { %1374 = vrcp.f32 %v727_v1 }
 0xbdf   :  { %v1375_v2 = vpop.eup %1374 }
 0xbe0   :  { %v749_v10 = vsub.f32 1.0, %v1375_v2  ;;  %v755_v13 = vmul.f32 %v1375_v2, %v637_v53 }
 0xc3a   :  { %v740_v3 = vpop.permute.xlu1 %739 }
 0xc3b   :  { %v742_v5 = vmul.f32 %v1375_v2, %v740_v3  ;;  %v151_v2 = vcombine.high %v149_v44, %v149_v44 }
 0xc3d   :  { %744 = vrot.lane.b32.xlu0 %v742_v5, %s1399_s0 }
 0xcaf   :  { %v745_v6 = vpop.permute.xlu0 %744 }
 0xcb0   :  { %v747_v7 = vadd.f32 %v745_v6, %v142_v60 }
 0xcb2   :  { %1376 = vtanh.f32 %v747_v7 }
 0xcbc   :  { %v1377_v9 = vpop.eup %1376 }
 0xcbd   :  { %751 = vrot.lane.b32.xlu1 %v1377_v9, %s1401_s3 }
 0xd2f   :  { %v752_v12 = vpop.permute.xlu1 %751 }
 0xd30   :  { %v754_v14 = vmul.f32 %v752_v12, %v749_v10 }
 0xd32   :  { %v756_v15 = vadd.f32 %v755_v13, %v754_v14 }
 0xd34   :  { %v764_v16 = vrot.slane %v756_v15, %v1493_v23 }
 0xd36   :  { %765 = vrot.lane.b32.xlu0 %v764_v16, %s1401_s3 }
 0xda8   :  { %v766_v18 = vpop.permute.xlu0 %765 }
 0xda9   :  { %1148 = vst.msk [vmem:[%s1635_s5 + $0x8] sm:$0x3] %vm292_vm3, %v766_v18  ;;  %1270 = vmatmul.mubr.msk.f32.vlgmr.msra.gmra.mrb[6].mxu0 %vm170_vm4, %v766_v18 }
 0xdaa   :  { %1338 = vmatpush3.bf16.msra.mxu0 %v1443_v4  ;;  %1291 = vmatprep.mubr.msk.f32.mxu0 %vm1397_vm2, %v1398_v8 }
 0xdab   :  { %1339 = vmatprep.subr.bf16.mxu0 %v1396_v0 }
 0xdae   :  { %1341 = vmatpush3.bf16.msra.mxu0 %v1466_v11 }
 0xe7c   :  { %v838_v19 = vpop.f32.mrb[6].mxu0 }
 0xe7d   :  { %v849_v20 = vadd.f32 %v838_v19, %v1491_v21  ;;  %v1271_v22 = vpop.f32.mrb[7].mxu0  ;;  %v842_v26 = vadd.f32 %v838_v19, %v150_v25 }
 0xe7f   :  { %v857_v24 = vrot.slane %v849_v20, %v1493_v23  ;;  %v1150_v27 = vmul.f32 -1.442695, %v842_v26 }
 0xe81   :  { %858 = vrot.lane.b32.xlu1 %v857_v24, %s1399_s0  ;;  %1378 = vpow2.f32 %v1150_v27 }
 0xe8b   :  { %v1379_v4 = vpop.eup %1378 }
 0xe8c   :  { %v846_v28 = vadd.f32 1.0, %v1379_v4 }
 0xe8e   :  { %1380 = vrcp.f32 %v846_v28 }
 0xe98   :  { %v1381_v8 = vpop.eup %1380 }
 0xe99   :  { %v868_v32 = vsub.f32 1.0, %v1381_v8  ;;  %v874_v34 = vmul.f32 %v1381_v8, %v756_v15 }
 0xef3   :  { %v859_v29 = vpop.permute.xlu1 %858 }
 0xef4   :  { %v861_v0 = vmul.f32 %v1381_v8, %v859_v29 }
 0xef6   :  { %863 = vrot.lane.b32.xlu0 %v861_v0, %s1399_s0 }
 0xf68   :  { %v864_v11 = vpop.permute.xlu0 %863 }
 0xf69   :  { %v866_v30 = vadd.f32 %v864_v11, %v150_v25 }
 0xf6b   :  { %1382 = vtanh.f32 %v866_v30 }
 0xf75   :  { %v1383_v31 = vpop.eup %1382 }
 0xf76   :  { %870 = vrot.lane.b32.xlu1 %v1383_v31, %s1401_s3 }
 0xfe8   :  { %v871_v33 = vpop.permute.xlu1 %870 }
 0xfe9   :  { %v873_v35 = vmul.f32 %v871_v33, %v868_v32 }
 0xfeb   :  { %v875_v36 = vadd.f32 %v874_v34, %v873_v35 }
 0xfed   :  { %v883_v37 = vrot.slane %v875_v36, %v1493_v23 }
 0xfef   :  { %884 = vrot.lane.b32.xlu0 %v883_v37, %s1401_s3 }
0x1061   :  { %v885_v38 = vpop.permute.xlu0 %884 }
0x1062   :  { %1151 = vst.msk [vmem:[%s1635_s5 + $0xa] sm:$0x3] %vm292_vm3, %v885_v38  ;;  %1281 = vmatmul.mubr.msk.f32.vlgmr.msra.gmra.mrb[6].mxu1 %vm170_vm4, %v885_v38 }
0x1135   :  { %v957_v39 = vpop.f32.mrb[6].mxu1 }
0x1136   :  { %v968_v40 = vadd.f32 %v957_v39, %v1491_v21  ;;  %v1282_v41 = vpop.f32.mrb[7].mxu1  ;;  %v961_v45 = vadd.f32 %v957_v39, %v149_v44 }
0x1138   :  { %v976_v42 = vrot.slane %v968_v40, %v1493_v23  ;;  %v1153_v46 = vmul.f32 -1.442695, %v961_v45 }
0x113a   :  { %977 = vrot.lane.b32.xlu1 %v976_v42, %s1399_s0  ;;  %1384 = vpow2.f32 %v1153_v46 }
0x1144   :  { %v1385_v47 = vpop.eup %1384 }
0x1145   :  { %v965_v48 = vadd.f32 1.0, %v1385_v47 }
0x1147   :  { %1386 = vrcp.f32 %v965_v48 }
0x1151   :  { %v1387_v49 = vpop.eup %1386 }
0x1152   :  { %v987_v17 = vsub.f32 1.0, %v1387_v49  ;;  %v993_v56 = vmul.f32 %v1387_v49, %v875_v36 }
0x11ac   :  { %v978_v50 = vpop.permute.xlu1 %977 }
0x11ad   :  { %v980_v51 = vmul.f32 %v1387_v49, %v978_v50 }
0x11af   :  { %982 = vrot.lane.b32.xlu0 %v980_v51, %s1399_s0 }
0x1221   :  { %v983_v52 = vpop.permute.xlu0 %982 }
0x1222   :  { %v985_v53 = vadd.f32 %v983_v52, %v149_v44 }
0x1224   :  { %1388 = vtanh.f32 %v985_v53 }
0x122e   :  { %v1389_v54 = vpop.eup %1388 }
0x122f   :  { %989 = vrot.lane.b32.xlu1 %v1389_v54, %s1401_s3 }
0x12a1   :  { %v990_v55 = vpop.permute.xlu1 %989 }
0x12a2   :  { %v992_v57 = vmul.f32 %v990_v55, %v987_v17 }
0x12a4   :  { %v994_v58 = vadd.f32 %v993_v56, %v992_v57 }
0x12a6   :  { %v1002_v59 = vrot.slane %v994_v58, %v1493_v23 }
0x12a8   :  { %1003 = vrot.lane.b32.xlu0 %v1002_v59, %s1401_s3 }
0x131a   :  { %v1004_v60 = vpop.permute.xlu0 %1003 }
0x131b   :  { %1154 = vst.msk [vmem:[%s1635_s5 + $0xc] sm:$0x3] %vm292_vm3, %v1004_v60  ;;  %1292 = vmatmul.mubr.msk.f32.vlgmr.msra.gmra.mrb[8].mxu0 %vm170_vm4, %v1004_v60 }
0x13ee   :  { %v1076_v61 = vpop.f32.mrb[8].mxu0 }
0x13ef   :  { %v1087_v62 = vadd.f32 %v1076_v61, %v1491_v21  ;;  %v1293_v63 = vpop.f32.mrb[9].mxu0  ;;  %v1080_v3 = vadd.f32 %v1076_v61, %v151_v2 }
0x13f1   :  { %v1095_v1 = vrot.slane %v1087_v62, %v1493_v23  ;;  %v1156_v5 = vmul.f32 -1.442695, %v1080_v3 }
0x13f3   :  { %1096 = vrot.lane.b32.xlu1 %v1095_v1, %s1399_s0  ;;  %1390 = vpow2.f32 %v1156_v5 }
0x13fd   :  { %v1391_v6 = vpop.eup %1390 }
0x13fe   :  { %v1084_v7 = vadd.f32 1.0, %v1391_v6 }
0x1400   :  { %1392 = vrcp.f32 %v1084_v7 }
0x140a   :  { %v1393_v9 = vpop.eup %1392 }
0x140b   :  { %v1106_v15 = vsub.f32 1.0, %v1393_v9  ;;  %v1112_v18 = vmul.f32 %v1393_v9, %v994_v58 }
0x1465   :  { %v1097_v10 = vpop.permute.xlu1 %1096 }
0x1466   :  { %v1099_v12 = vmul.f32 %v1393_v9, %v1097_v10 }
0x1468   :  { %1101 = vrot.lane.b32.xlu0 %v1099_v12, %s1399_s0 }
0x14da   :  { %v1102_v13 = vpop.permute.xlu0 %1101 }
0x14db   :  { %v1104_v14 = vadd.f32 %v1102_v13, %v151_v2 }
0x14dd   :  { %1394 = vtanh.f32 %v1104_v14 }
0x14e7   :  { %v1395_v21 = vpop.eup %1394 }
0x14e8   :  { %1108 = vrot.lane.b32.xlu1 %v1395_v21, %s1401_s3 }
0x155a   :  { %v1109_v16 = vpop.permute.xlu1 %1108 }
0x155b   :  { %v1111_v19 = vmul.f32 %v1109_v16, %v1106_v15 }
0x155d   :  { %v1113_v20 = vadd.f32 %v1112_v18, %v1111_v19 }
0x155f   :  { %v1121_v22 = vrot.slane %v1113_v20, %v1493_v23 }
0x1561   :  { %1122 = vrot.lane.b32.xlu0 %v1121_v22, %s1401_s3 }
0x15d3   :  { %v1123_v24 = vpop.permute.xlu0 %1122 }
0x15d4   :  { %1157 = vst.msk [vmem:[%s1635_s5 + $0xe] sm:$0x3] %vm292_vm3, %v1123_v24 }

</bundles_post_ra>
